<compile_context>
chip_gen: v6e
topology: v6e:2x2x1
jax: 0.10.0
libtpu: 0.0.40
codegen_flags: <defaults>
</compile_context>

<pallas_src>
import jax
import jax.numpy as jnp
from jax.experimental import pallas as pl
from jax.experimental.pallas import tpu as pltpu


def _round_up(x, m):
    return ((x + m - 1) // m) * m


def _cdiv(a, b):
    return -(-a // b)


def classifier_head_kernel(x_ref, w1_ref, b1_ref, w2_ref, b2_ref, o_ref):
    # Cast the batch tile to the weight dtype in-kernel (no extra HBM pass).
    x = x_ref[...].astype(w1_ref.dtype)
    # Hidden layer: (TB, D) @ (D, H) on the MXU, f32 accumulation.
    h = jnp.dot(x, w1_ref[...], preferred_element_type=jnp.float32)
    # Bias + ReLU on the VPU in f32.
    h = jnp.maximum(h + b1_ref[...], 0.0)
    # Output layer: (TB, H) @ (H, C_pad); activations back to weight dtype so
    # the second matmul also takes the fast MXU path.
    out = jnp.dot(h.astype(w2_ref.dtype), w2_ref[...],
                  preferred_element_type=jnp.float32)
    # Store only the real C logit columns (w2's lane-padding columns are
    # dropped here instead of being written to HBM).
    c = o_ref.shape[-1]
    o_ref[...] = (out[:, :c] + b2_ref[...]).astype(o_ref.dtype)


def classifier_head(x, w1, b1, w2, b2, *, block_b=2048, use_bf16=True):
    """x: (B, latent_dim); w1: (D, 128); b1: (128,)|(1,128);
    w2: (128, C); b2: (C,)|(1,C). Returns (B, C) float32.

    Note: for genuinely tiny deployed batches (B ~ 2) the pallas_call + DMA
    setup cost dominates; prefer fusing this head into the preceding kernel
    or leaving it to XLA in that regime.
    """
    B, D = x.shape
    H = w1.shape[1]
    C = w2.shape[1]
    assert w1.shape == (D, H)
    assert w2.shape == (H, C)

    b1 = jnp.reshape(b1, (1, H)).astype(jnp.float32)
    b2 = jnp.reshape(b2, (1, C)).astype(jnp.float32)

    # Pad only the *weight* classifier width to 128 lanes (lane-dense MXU
    # result); the HBM output stays C wide.  Zero columns are sliced off in
    # the kernel, so zero-padding is safe.
    C_pad = _round_up(C, 128)
    if C_pad != C:
        w2 = jnp.pad(w2, ((0, 0), (0, C_pad - C)))

    # --- batch tiling ---
    # Number of tiles: cap the tile at block_b rows, and when B is large
    # enough use at least 2 tiles so the "parallel" axis shards across both
    # v7x TensorCores (v5e/v6e have one TC; extra tiles cost little there).
    n_tiles = max(_cdiv(B, block_b), 2 if B >= 16 else 1)
    TB = _round_up(_cdiv(B, n_tiles), 8)          # multiple of 8 sublanes
    B_pad = _round_up(B, TB)                       # pad only a few rows
    if B_pad != B:
        x = jnp.pad(x, ((0, B_pad - B), (0, 0)))

    # One-time bf16 cast for the tiny, VMEM-resident weights only.
    w_dtype = jnp.bfloat16 if use_bf16 else jnp.float32
    w1_op = w1.astype(w_dtype)
    w2_op = w2.astype(w_dtype)

    # Rough per-step VMEM footprint; raise the scoped limit only when the
    # default (16 MiB on v5e) would be tight.
    tile_bytes = (
        2 * TB * D * x.dtype.itemsize              # x tile, double-buffered
        + 2 * TB * _round_up(C, 128) * 4           # out tile (lane-padded in VMEM)
        + TB * H * 4 + TB * C_pad * 4              # h / pre-store intermediates
        + (D * H + H * C_pad) * w1_op.dtype.itemsize + (H + C) * 4)
    vmem_limit = None
    if tile_bytes > 12 * 1024 * 1024:
        vmem_limit = min(2 * tile_bytes, 64 * 1024 * 1024)

    out = pl.pallas_call(
        classifier_head_kernel,
        out_shape=jax.ShapeDtypeStruct((B_pad, C), jnp.float32),
        grid=(B_pad // TB,),
        in_specs=[
            pl.BlockSpec((TB, D), lambda i: (i, 0)),       # x: tiled over batch
            pl.BlockSpec((D, H), lambda i: (0, 0)),        # w1: VMEM-resident
            pl.BlockSpec((1, H), lambda i: (0, 0)),        # b1: resident
            pl.BlockSpec((H, C_pad), lambda i: (0, 0)),    # w2: resident
            pl.BlockSpec((1, C), lambda i: (0, 0)),        # b2: resident
        ],
        out_specs=pl.BlockSpec((TB, C), lambda i: (i, 0)),
        compiler_params=pltpu.CompilerParams(
            dimension_semantics=("parallel",),
            vmem_limit_bytes=vmem_limit),
    )(x, w1_op, b1, w2_op, b2)

    # Drop the (small) batch padding; class width is already exact.
    return out[:B] if B_pad != B else out


def reference(x, w1, b1, w2, b2):
    h = jnp.maximum(x @ w1 + jnp.reshape(b1, (1, -1)), 0.0)
    return h @ w2 + jnp.reshape(b2, (1, -1))


if __name__ == "__main__":
    # Small shapes consistent with the module.
    batch = 2
    latent_dim = 32
    hidden = 128           # fixed by the module definition
    num_classes = 10

    key = jax.random.PRNGKey(0)
    kx, kw1, kb1, kw2, kb2 = jax.random.split(key, 5)

    x = jax.random.normal(kx, (batch, latent_dim), dtype=jnp.float32)

    # Deterministic synthetic parameters (no checkpoint).
    w1 = jax.random.normal(kw1, (latent_dim, hidden), dtype=jnp.float32) * 0.05
    b1 = jax.random.normal(kb1, (1, hidden), dtype=jnp.float32) * 0.01
    w2 = jax.random.normal(kw2, (hidden, num_classes), dtype=jnp.float32) * 0.05
    b2 = jax.random.normal(kb2, (1, num_classes), dtype=jnp.float32) * 0.01

    out = classifier_head(x, w1, b1, w2, b2)
    out = jax.block_until_ready(out)

    ref = reference(x, w1, b1, w2, b2)
    assert out.shape == (batch, num_classes)
    # bf16 MXU operands with f32 accumulation -> ~1e-2-scale tolerance.
    assert jnp.allclose(out, ref, atol=2e-2, rtol=2e-2), (
        float(jnp.max(jnp.abs(out - ref))))

    print("KERNEL_OK")
</pallas_src>

<mosaic_0001>
module attributes {stable_mosaic.version = 11 : i64} {
  func.func @classifier_head_kernel(%arg0: i32, %arg1: memref<8x32xf32, #tpu.memory_space<vmem>>, %arg2: memref<32x128xbf16, #tpu.memory_space<vmem>>, %arg3: memref<1x128xf32, #tpu.memory_space<vmem>>, %arg4: memref<128x128xbf16, #tpu.memory_space<vmem>>, %arg5: memref<1x10xf32, #tpu.memory_space<vmem>>, %arg6: memref<8x10xf32, #tpu.memory_space<vmem>>) attributes {dimension_semantics = [#tpu.dimension_semantics<parallel>], iteration_bounds = array<i64: 1>, scalar_prefetch = 0 : i64, scratch_operands = 0 : i64, tpu.core_type = #tpu.core_type<tc>, window_params = [{transform_indices = @transform_0, window_bounds = array<i64: 8, 32>}, {pipeline_mode = #tpu.pipeline_mode<synchronous>, transform_indices = @transform_1, window_bounds = array<i64: 32, 128>}, {pipeline_mode = #tpu.pipeline_mode<synchronous>, transform_indices = @transform_2, window_bounds = array<i64: 1, 128>}, {pipeline_mode = #tpu.pipeline_mode<synchronous>, transform_indices = @transform_3, window_bounds = array<i64: 128, 128>}, {pipeline_mode = #tpu.pipeline_mode<synchronous>, transform_indices = @transform_4, window_bounds = array<i64: 1, 10>}, {transform_indices = @transform_5, window_bounds = array<i64: 8, 10>}]} {
    %c0 = arith.constant 0 : index
    %c0_0 = arith.constant 0 : index
    %0 = vector.load %arg1[%c0, %c0_0] : memref<8x32xf32, #tpu.memory_space<vmem>>, vector<8x32xf32>
    %1 = arith.truncf %0 : vector<8x32xf32> to vector<8x32xbf16>
    %c0_1 = arith.constant 0 : index
    %c0_2 = arith.constant 0 : index
    %2 = vector.load %arg2[%c0_1, %c0_2] : memref<32x128xbf16, #tpu.memory_space<vmem>>, vector<32x128xbf16>
    %cst = arith.constant dense<0.000000e+00> : vector<8x128xf32>
    %3 = tpu.matmul %1, %2, %cst {dimension_numbers = #tpu.dot_dimension_numbers<[1], [0], [0], [1], [0, 0, 1, 1], [], []>} : vector<8x32xbf16>, vector<32x128xbf16>, vector<8x128xf32> -> vector<8x128xf32>
    %c0_3 = arith.constant 0 : index
    %c0_4 = arith.constant 0 : index
    %4 = vector.load %arg3[%c0_3, %c0_4] : memref<1x128xf32, #tpu.memory_space<vmem>>, vector<1x128xf32>
    %5 = vector.broadcast %4 : vector<1x128xf32> to vector<8x128xf32>
    %6 = arith.addf %3, %5 : vector<8x128xf32>
    %cst_5 = arith.constant 0.000000e+00 : f32
    %7 = vector.broadcast %cst_5 : f32 to vector<8x128xf32>
    %8 = arith.maximumf %6, %7 : vector<8x128xf32>
    %9 = arith.truncf %8 : vector<8x128xf32> to vector<8x128xbf16>
    %c0_6 = arith.constant 0 : index
    %c0_7 = arith.constant 0 : index
    %10 = vector.load %arg4[%c0_6, %c0_7] : memref<128x128xbf16, #tpu.memory_space<vmem>>, vector<128x128xbf16>
    %cst_8 = arith.constant dense<0.000000e+00> : vector<8x128xf32>
    %11 = tpu.matmul %9, %10, %cst_8 {dimension_numbers = #tpu.dot_dimension_numbers<[1], [0], [0], [1], [0, 0, 1, 1], [], []>} : vector<8x128xbf16>, vector<128x128xbf16>, vector<8x128xf32> -> vector<8x128xf32>
    %12 = vector.extract_strided_slice %11 {offsets = [0, 0], sizes = [8, 10], strides = [1, 1]} : vector<8x128xf32> to vector<8x10xf32>
    %c0_9 = arith.constant 0 : index
    %c0_10 = arith.constant 0 : index
    %13 = vector.load %arg5[%c0_9, %c0_10] : memref<1x10xf32, #tpu.memory_space<vmem>>, vector<1x10xf32>
    %14 = vector.broadcast %13 : vector<1x10xf32> to vector<8x10xf32>
    %15 = arith.addf %12, %14 : vector<8x10xf32>
    %c0_11 = arith.constant 0 : index
    %c0_12 = arith.constant 0 : index
    %16 = vector.load %arg6[%c0_11, %c0_12] : memref<8x10xf32, #tpu.memory_space<vmem>>, vector<8x10xf32>
    tpu.vector_store %arg6[%c0_11, %c0_12], %15 {strides = array<i32>} : memref<8x10xf32, #tpu.memory_space<vmem>>, vector<8x10xf32>,
    return
  }
  func.func @transform_0(%arg0: i32) -> (i32, i32) {
    %c0_i32 = arith.constant 0 : i32
    %c0_i32_0 = arith.constant 0 : i32
    return %arg0, %c0_i32 : i32, i32
  }
  func.func @transform_1(%arg0: i32) -> (i32, i32) {
    %c0_i32 = arith.constant 0 : i32
    %c0_i32_0 = arith.constant 0 : i32
    %c0_i32_1 = arith.constant 0 : i32
    return %c0_i32, %c0_i32_0 : i32, i32
  }
  func.func @transform_2(%arg0: i32) -> (i32, i32) {
    %c0_i32 = arith.constant 0 : i32
    %c0_i32_0 = arith.constant 0 : i32
    %c0_i32_1 = arith.constant 0 : i32
    return %c0_i32, %c0_i32_0 : i32, i32
  }
  func.func @transform_3(%arg0: i32) -> (i32, i32) {
    %c0_i32 = arith.constant 0 : i32
    %c0_i32_0 = arith.constant 0 : i32
    %c0_i32_1 = arith.constant 0 : i32
    return %c0_i32, %c0_i32_0 : i32, i32
  }
  func.func @transform_4(%arg0: i32) -> (i32, i32) {
    %c0_i32 = arith.constant 0 : i32
    %c0_i32_0 = arith.constant 0 : i32
    %c0_i32_1 = arith.constant 0 : i32
    return %c0_i32, %c0_i32_0 : i32, i32
  }
  func.func @transform_5(%arg0: i32) -> (i32, i32) {
    %c0_i32 = arith.constant 0 : i32
    %c0_i32_0 = arith.constant 0 : i32
    return %arg0, %c0_i32 : i32, i32
  }
}

</mosaic_0001>

<bundles_post_ra>
// kernel: tpu_custom_call.1
= control target key start
LH: loop header
LB: loop body
LE: loop exit
PB: predicated region body
PF: predicated region fallthrough
CT: control target
= control target key end

     0   :  { %10 = vsyncpa [#allocation3], 0  ;;  %s475_s0 = inlined_call_operand.hbm [shape: f32[8,32], index: 0, kind: input, shape index: {}]   ;;  %s476_s1 = inlined_call_operand.hbm [shape: bf16[32,128], index: 1, kind: input, shape index: {}]   ;;  %s477_s2 = inlined_call_operand.vmem [shape: f32[1,128], index: 2, kind: input, shape index: {}]   ;;  %s478_s3 = inlined_call_operand.hbm [shape: bf16[128,128], index: 3, kind: input, shape index: {}]   ;;  %s479_s4 = inlined_call_operand.vmem [shape: f32[1,10], index: 4, kind: input, shape index: {}]   ;;  %s480_s5 = inlined_call_operand.hbm [shape: f32[8,10], index: 5, kind: output, shape index: {}]  }
   0x1   :  { %11 = vsyncpa [#allocation6], 0 }
   0x2   :  { %12 = vsyncpa [#allocation4], 0  ;;  %s419_s18 = smov [#allocation5]  }
   0x3   :  { %s28_s19 = sshll.u32 %s419_s18, 4  ;;  %s29_s19 = int_to_ptr.vmem [resolvable:$true] %s28_s19 }
   0x4   :  { %s341_s20 = scalar_lea.vmem %s29_s19, 256  ;;  %p346_p1 = scmp.lt.s32.totalorder %s29_s19, %s29_s19 }
   0x5   :  { %p342_p0 = scmp.ne.s32.totalorder %s29_s19, %s341_s20  ;;  %p347_p2 = scmp.lt.s32.totalorder %s341_s20, %s341_s20 }
   0x7   :  { %p348_p3 = por %p347_p2, %p346_p1 }
   0x9   :  { %p349_p4 = pnand %p348_p3, %p342_p0 }
   0xb   :  { %352 = shalt.err (!%p349_p4)
}
   0xc   :  { %s420_s21 = smov 64   ;;  %s421_s22 = smov 4  }
   0xd   :  { %34 = dma.hbm_to_vmem [thread:$0]  %s476_s1, 256, %s29_s19, [#allocation6], %s420_s21, %s420_s21, %s421_s22  }
   0xe   :  { %s422_s25 = smov [#allocation2]   ;;  %s423_s27 = smov [#allocation7]  }
   0xf   :  { %s19_s26 = sshll.u32 %s422_s25, 4  ;;  %s42_s28 = sshll.u32 %s423_s27, 4  ;;  %s20_s26 = int_to_ptr.vmem [resolvable:$true] %s19_s26  ;;  %s43_s28 = int_to_ptr.vmem [resolvable:$true] %s42_s28 }
  0x10   :  { %s361_s29 = scalar_lea.vmem %s20_s26, 128  ;;  %p366_p6 = scmp.lt.s32.totalorder %s20_s26, %s20_s26 }
  0x11   :  { %p362_p5 = scmp.ne.s32.totalorder %s20_s26, %s361_s29  ;;  %p367_p7 = scmp.lt.s32.totalorder %s361_s29, %s361_s29 }
  0x13   :  { %p368_p8 = por %p367_p7, %p366_p6 }
  0x15   :  { %p369_p9 = pnand %p368_p8, %p362_p5 }
  0x17   :  { %372 = shalt.err (!%p369_p9)
}
  0x18   :  { %22 = dma.hbm_to_vmem [thread:$0]  %s475_s0, 128, %s20_s26, [#allocation3]  }
  0x19   :  { %s381_s7 = scalar_lea.vmem %s43_s28, 1024  ;;  %p386_p11 = scmp.lt.s32.totalorder %s43_s28, %s43_s28 }
  0x1a   :  { %p382_p10 = scmp.ne.s32.totalorder %s43_s28, %s381_s7  ;;  %p387_p12 = scmp.lt.s32.totalorder %s381_s7, %s381_s7 }
  0x1c   :  { %p388_p13 = por %p387_p12, %p386_p11 }
  0x1e   :  { %p389_p0 = pnand %p388_p13, %p382_p10 }
  0x20   :  { %392 = shalt.err (!%p389_p0)
}
  0x21   :  { %48 = dma.hbm_to_vmem [thread:$0]  %s478_s3, 1024, %s43_s28, [#allocation6], %s420_s21, %s420_s21, %s421_s22  }
  0x22   :  { %413 = dma.done.wait [#allocation3], 128  }
  0x23   :  { %414 = vsyncadd [#allocation3], 4294967168 }
  0x24   :  { %415 = dma.done.wait [#allocation6], 1280  }
  0x25   :  { %416 = vsyncadd [#allocation6], 4294966016  ;;  %v424_v0 = vmov 0.0   ;;  %vm425_vm0 = vmmov 0   ;;  %v323_v1 = vld [vmem:[#allocation5 + $0x8] sm:$0xff]   ;;  %v324_v2 = vld [vmem:[#allocation5] sm:$0xff]  }
  0x26   :  { %287 = vmatprep.subr.bf16.mxu0 %v424_v0  ;;  %291 = vmatprep.mubr.msk.bf16.mxu0 %vm425_vm0, %v424_v0  ;;  %v61_v3 = vld [vmem:[#allocation2] sm:$0xff]  ;;  %v325_v4 = vld [vmem:[#allocation7 + $0x38] sm:$0xff]   ;;  %v326_v6 = vld [vmem:[#allocation7 + $0x30] sm:$0xff]   ;;  %vm86_vm1 = vcmask 261120   ;;  %s426_s11 = smov [#allocation8]   ;;  %vm244_vm2 = vcmask 80896  }
  0x27   :  { %295 = vmatprep.subr.bf16.mxu1 %v424_v0  ;;  %311 = vmatprep.mubr.msk.bf16.mxu1 %vm425_vm0, %v424_v0  ;;  %v62_v5 = vpack.c.bf16 %v61_v3, %v61_v3  ;;  %v327_v7 = vld [vmem:[#allocation7 + $0x28] sm:$0xff]   ;;  %v328_v8 = vld [vmem:[#allocation7 + $0x20] sm:$0xff]   ;;  %v329_v9 = vld [vmem:[#allocation7 + $0x18] sm:$0xff]   ;;  %s252_s12 = sshll.u32 %s426_s11, 4  ;;  %s253_s12 = int_to_ptr.vmem [resolvable:$true] %s252_s12 }
  0x28   :  { %288 = vmatpush3.bf16.msra.mxu0 %v323_v1  ;;  %296 = vmatpush3.bf16.msra.mxu1 %v325_v4  ;;  %v330_v10 = vld [vmem:[#allocation7 + $0x10] sm:$0xff]   ;;  %v331_v11 = vld [vmem:[#allocation7 + $0x8] sm:$0xff]   ;;  %v332_v12 = vld [vmem:[#allocation7] sm:$0xff]   ;;  %p398_p2 = scmp.lt.s32.totalorder %s253_s12, %s253_s12 }
  0x29   :  { %289 = vmatprep.subr.bf16.mxu0 %v424_v0  ;;  %297 = vmatprep.subr.bf16.mxu1 %v424_v0  ;;  %v262_v13 = vld [vmem:[%s477_s2] ss:$0 sm:$0xff]  ;;  %s393_s2 = scalar_lea.vmem %s253_s12, 128 }
  0x2a   :  { %v274_v21 = vld [vmem:[%s479_s4] ss:$0 sm:$0xff]  ;;  %p394_p1 = scmp.ne.s32.totalorder %s253_s12, %s393_s2  ;;  %p399_p3 = scmp.lt.s32.totalorder %s393_s2, %s393_s2 }
  0x2c   :  { %290 = vmatpush3.bf16.msra.mxu0 %v324_v2  ;;  %298 = vmatpush3.bf16.msra.mxu1 %v326_v6  ;;  %p400_p4 = por %p399_p3, %p398_p2 }
  0x2d   :  { %299 = vmatprep.subr.bf16.mxu1 %v424_v0 }
  0x2e   :  { %p401_p5 = pnand %p400_p4, %p394_p1 }
  0x2f   :  { %292 = vmatmul.mubr.msk.bf16.vlgmr.msra.gmra.mxu0 %vm86_vm1, %v62_v5 }
  0x30   :  { %300 = vmatpush3.bf16.msra.mxu1 %v327_v7 }
  0x31   :  { %301 = vmatprep.subr.bf16.mxu1 %v424_v0 }
  0x34   :  { %302 = vmatpush3.bf16.msra.mxu1 %v328_v8 }
  0x35   :  { %303 = vmatprep.subr.bf16.mxu1 %v424_v0 }
  0x38   :  { %304 = vmatpush3.bf16.msra.mxu1 %v329_v9 }
  0x39   :  { %305 = vmatprep.subr.bf16.mxu1 %v424_v0 }
  0x3c   :  { %306 = vmatpush3.bf16.msra.mxu1 %v330_v10 }
  0x3d   :  { %307 = vmatprep.subr.bf16.mxu1 %v424_v0 }
  0x40   :  { %308 = vmatpush3.bf16.msra.mxu1 %v331_v11 }
  0x41   :  { %309 = vmatprep.subr.bf16.mxu1 %v424_v0 }
  0x44   :  { %310 = vmatpush3.bf16.msra.mxu1 %v332_v12 }
  0xef   :  { %v124_v14 = vpop.f32.mrf.mxu0 }
  0xf0   :  { %v125_v15 = vadd.f32 %v262_v13, %v124_v14 }
  0xf1   :  { %v293_v16 = vpop.f32.mrf.mxu0 }
  0xf2   :  { %v130_v17 = vmax.f32 %v125_v15, 0.0 }
  0xf3   :  { %v127_v18 = vpop.f32.mrf.mxu0 }
  0xf4   :  { %v131_v19 = vpack.c.bf16 %v130_v17, %v130_v17 }
  0xf5   :  { %v294_v20 = vpop.f32.mrf.mxu0 }
  0xf6   :  { %312 = vmatmul.mubr.bf16.vlgmr.msra.gmra.mxu1 %v131_v19 }
 0x1b6   :  { %v230_v22 = vpop.f32.mrf.mxu1 }
 0x1b7   :  { %v243_v23 = vadd.f32 %v274_v21, %v230_v22 }
 0x1b8   :  { %v313_v24 = vpop.f32.mrf.mxu1 }
 0x1b9   :  { %245 = vst.msk [vmem:[#allocation8] sm:$0xff] %vm244_vm2, %v243_v23 }
 0x1ba   :  { %v233_v25 = vpop.f32.mrf.mxu1 }
 0x1bb   :  { %404 = shalt.err (!%p401_p5)
}
 0x1bc   :  { %255 = dma.vmem_to_hbm [thread:$0]  %s253_s12, 128, %s480_s5, [#allocation4]   ;;  %v314_v26 = vpop.f32.mrf.mxu1 }
 0x1bd   :  { %417 = dma.done.wait [#allocation4], 128  }
 0x1be   :  { %418 = vsyncadd [#allocation4], 4294967168 }
 0x1bf   :  { %259 = vsyncpa [#allocation3], 1 }
 0x1c0   :  { %260 = vsyncpa [#allocation6], 1 }
 0x1c1   :  { %261 = vsyncpa [#allocation4], 1 }

</bundles_post_ra>
